<compile_context>
chip_gen: v7x
topology: tpu7x:2x2x1
jax: 0.10.0
libtpu: 0.0.40
codegen_flags: <defaults>
</compile_context>

<pallas_src>
import jax
import jax.numpy as jnp
from jax import lax
from jax.experimental import pallas as pl
from jax.experimental.pallas import tpu as pltpu

# Hyper-parameters from the PyTorch script
BATCH_SIZE = 1
EMBEDDING_SIZE = 10
HIDDEN_SIZE = 5
INPUT_SIZE = 5        # vocab size
NUM_CLASS = 5
NUM_LAYERS = 2
SEQ_LEN = 6

# output.view(-1, num_class) in the PyTorch module is only valid because of this:
assert HIDDEN_SIZE == NUM_CLASS

_V, _H, _T = INPUT_SIZE, HIDDEN_SIZE, SEQ_LEN
_H2 = 2 * _H          # combined state width  [layer1 | layer0]
_GW = 8 * _H          # fused gate width: 4 gates x 2 layers x H
# Packed-parameter row layout (columns = 8H, gate-interleaved):
#   rows [0, V)      : embedding folded into layer-0 input proj (+ b0), layer-1 half = 0
#   rows [V, V+H)    : weights applied to h1 state  ([whh1 | 0] per gate)
#   rows [V+H, V+2H) : weights applied to h0 state  ([wih1 | whh0] per gate)
#   row  V+2H        : b1 = b_ih1 + b_hh1 in the layer-1 halves, 0 elsewhere
_ROWS = _V + 2 * _H + 1


def _lstm_kernel(idx_ref, p_ref, out_ref):
    V, H, H2, T = _V, _H, _H2, _T

    P = p_ref[...]                                   # (V+2H+1, 8H) single load
    table = P[0:V, :]                                # (V, 8H)  token -> layer-0 gates (+b0)
    w_fused = P[V:V + H2, :]                         # (2H, 8H) fused recurrent/input weights
    b1_row = P[V + H2:V + H2 + 1, :]                 # (1, 8H)  layer-1 bias (layer-0 half 0)

    # Hoisted token projection: one-hot gather through the folded table.
    # idx has T+1 rows; the last row is a -1 sentinel -> all-zero one-hot row.
    idx = idx_ref[...]                                           # (T+1, 1) int32
    iota_v = lax.broadcasted_iota(jnp.int32, (T + 1, V), 1)
    onehot = (idx == iota_v).astype(jnp.float32)                 # (T+1, V)
    gxa = jnp.dot(onehot, table,
                  preferred_element_type=jnp.float32)            # (T+1, 8H)
    # b1 is added from iteration 1 on; iteration 0 must keep the layer-1 half
    # of the gates at exactly 0 so (h1, c1) stay at their zero initial state.
    step_mask = (lax.broadcasted_iota(jnp.int32, (T + 1, 1), 0) > 0
                 ).astype(jnp.float32)
    addend = gxa + step_mask * b1_row                            # (T+1, 8H)

    # Combined state: h = [h1(t-1), h0(t)], c = [c1(t-1), c0(t)].
    h = jnp.zeros((1, H2), jnp.float32)
    c = jnp.zeros((1, H2), jnp.float32)
    outs = []
    # T+1 is static -> fully unrolled; one basic block for the scheduler.
    for p in range(T + 1):
        # One fused matmul yields layer-1 gates for step p-1 and layer-0 gates
        # for step p simultaneously.
        g = jnp.dot(h, w_fused,
                    preferred_element_type=jnp.float32) + addend[p:p + 1, :]
        # 2 EUP issues on the full 8H vector cover both layers.
        s = jax.nn.sigmoid(g)
        th = jnp.tanh(g)
        i = s[:, 0:H2]
        f = s[:, H2:2 * H2]
        gg = th[:, 2 * H2:3 * H2]
        o = s[:, 3 * H2:4 * H2]
        c = f * c + i * gg
        h = o * jnp.tanh(c)
        if p >= 1:
            outs.append(h)                           # h[:, 0:H] == h1(p-1)

    hstack = jnp.concatenate(outs, axis=0)           # (T, 2H)
    # Single store of the whole (T, H) result (layer-1 hidden states).
    out_ref[...] = hstack[:, 0:H]


def init_params(key):
    ks = jax.random.split(key, 9)
    std = 1.0 / jnp.sqrt(jnp.float32(HIDDEN_SIZE))

    def u(k, shape):
        return jax.random.uniform(k, shape, jnp.float32, -std, std)

    emb = jax.random.normal(ks[0], (INPUT_SIZE, EMBEDDING_SIZE), jnp.float32)
    wih0 = u(ks[1], (4 * HIDDEN_SIZE, EMBEDDING_SIZE))
    whh0 = u(ks[2], (4 * HIDDEN_SIZE, HIDDEN_SIZE))
    bih0 = u(ks[3], (4 * HIDDEN_SIZE,))
    bhh0 = u(ks[4], (4 * HIDDEN_SIZE,))
    wih1 = u(ks[5], (4 * HIDDEN_SIZE, HIDDEN_SIZE))
    whh1 = u(ks[6], (4 * HIDDEN_SIZE, HIDDEN_SIZE))
    bih1 = u(ks[7], (4 * HIDDEN_SIZE,))
    bhh1 = u(ks[8], (4 * HIDDEN_SIZE,))
    return dict(
        emb=emb,
        wih0_t=wih0.T, whh0_t=whh0.T, b0=(bih0 + bhh0).reshape(1, -1),
        wih1_t=wih1.T, whh1_t=whh1.T, b1=(bih1 + bhh1).reshape(1, -1),
    )


def _interleave_gates(layer1_part, layer0_part):
    """Per-gate interleave (PyTorch i,f,g,o order): output columns are
    [g1_i, g0_i, g1_f, g0_f, g1_g, g0_g, g1_o, g0_o], each block H wide."""
    H = HIDDEN_SIZE
    parts = []
    for k in range(4):
        parts.append(layer1_part[..., k * H:(k + 1) * H])
        parts.append(layer0_part[..., k * H:(k + 1) * H])
    return jnp.concatenate(parts, axis=-1)


def pack_params(params):
    """Fold embedding (and b0) into layer-0 input weight, build the fused
    cross-layer weight, and pack everything into one [V+2H+1, 8H] f32 array
    -> a single HBM->VMEM DMA."""
    H = HIDDEN_SIZE
    # layer-0 token table with b0 folded in (the one-hot gather selects exactly
    # one row, so adding b0 to every row is exact).
    table0 = jnp.dot(params["emb"], params["wih0_t"],
                     precision=lax.Precision.HIGHEST) + params["b0"]   # (V, 4H)
    z_v = jnp.zeros_like(table0)
    z_h = jnp.zeros((H, 4 * H), jnp.float32)
    z_b = jnp.zeros_like(params["b1"])

    table_perm = _interleave_gates(z_v, table0)                  # (V, 8H)
    w_h1_rows = _interleave_gates(params["whh1_t"], z_h)         # (H, 8H)  multiplies h1
    w_h0_rows = _interleave_gates(params["wih1_t"],
                                  params["whh0_t"])              # (H, 8H)  multiplies h0
    b1_row = _interleave_gates(params["b1"], z_b)                # (1, 8H)

    packed = jnp.concatenate([table_perm, w_h1_rows, w_h0_rows, b1_row],
                             axis=0).astype(jnp.float32)
    assert packed.shape == (_ROWS, _GW)
    return packed


def lstm_forward(token_ids, packed_params):
    """token_ids: int32 (seq_len,) -> output (seq_len*batch, num_class)"""
    # pad with a -1 sentinel -> all-zero one-hot row for the drain iteration
    idx_pad = jnp.concatenate(
        [token_ids.astype(jnp.int32), jnp.full((1,), -1, jnp.int32)]
    ).reshape(SEQ_LEN + 1, 1)

    vmem = pltpu.MemorySpace.VMEM
    out = pl.pallas_call(
        _lstm_kernel,
        out_shape=jax.ShapeDtypeStruct((SEQ_LEN, HIDDEN_SIZE), jnp.float32),
        in_specs=[pl.BlockSpec(memory_space=vmem),
                  pl.BlockSpec(memory_space=vmem)],
        out_specs=pl.BlockSpec(memory_space=vmem),
    )(idx_pad, packed_params)
    # matches `output.view(-1, num_class)` with batch=1
    return out.reshape(-1, NUM_CLASS)


def lstm_reference(token_ids, params):
    """Pure-JAX reference of the same forward pass (PyTorch semantics)."""
    x = params["emb"][token_ids]                                 # (T, E)
    H = HIDDEN_SIZE

    def cell(x_t, h, c, wih_t, whh_t, b):
        g = x_t @ wih_t + h @ whh_t + b
        i = jax.nn.sigmoid(g[:, 0:H])
        f = jax.nn.sigmoid(g[:, H:2 * H])
        gg = jnp.tanh(g[:, 2 * H:3 * H])
        o = jax.nn.sigmoid(g[:, 3 * H:4 * H])
        c = f * c + i * gg
        return o * jnp.tanh(c), c

    h0 = c0 = h1 = c1 = jnp.zeros((1, H), jnp.float32)
    outs = []
    for t in range(SEQ_LEN):
        x_t = x[t:t + 1, :]
        h0, c0 = cell(x_t, h0, c0, params["wih0_t"], params["whh0_t"], params["b0"])
        h1, c1 = cell(h0, h1, c1, params["wih1_t"], params["whh1_t"], params["b1"])
        outs.append(h1)
    return jnp.concatenate(outs, axis=0).reshape(-1, NUM_CLASS)


if __name__ == "__main__":
    key = jax.random.PRNGKey(0)
    pkey, ikey = jax.random.split(key)
    params = init_params(pkey)
    packed = pack_params(params)

    # deterministic token sequence in [0, vocab)
    token_ids = jax.random.randint(ikey, (SEQ_LEN,), 0, INPUT_SIZE, dtype=jnp.int32)

    out = lstm_forward(token_ids, packed)
    out = jax.block_until_ready(out)

    ref = lstm_reference(token_ids, params)
    assert out.shape == (SEQ_LEN * BATCH_SIZE, NUM_CLASS)
    assert jnp.allclose(out, ref, atol=1e-4, rtol=1e-4)

    print("KERNEL_OK")
</pallas_src>

<mosaic_0001>
module attributes {stable_mosaic.version = 11 : i64} {
  func.func @_lstm_kernel(%arg0: memref<7x1xi32, #tpu.memory_space<vmem>>, %arg1: memref<16x40xf32, #tpu.memory_space<vmem>>, %arg2: memref<6x5xf32, #tpu.memory_space<vmem>>) attributes {dimension_semantics = [], scalar_prefetch = 0 : i64, scratch_operands = 0 : i64, tpu.core_type = #tpu.core_type<tc>} {
    %c0 = arith.constant 0 : index
    %c0_0 = arith.constant 0 : index
    %0 = vector.load %arg1[%c0, %c0_0] : memref<16x40xf32, #tpu.memory_space<vmem>>, vector<16x40xf32>
    %1 = vector.extract_strided_slice %0 {offsets = [0, 0], sizes = [5, 40], strides = [1, 1]} : vector<16x40xf32> to vector<5x40xf32>
    %2 = vector.extract_strided_slice %0 {offsets = [5, 0], sizes = [10, 40], strides = [1, 1]} : vector<16x40xf32> to vector<10x40xf32>
    %3 = vector.extract_strided_slice %0 {offsets = [15, 0], sizes = [1, 40], strides = [1, 1]} : vector<16x40xf32> to vector<1x40xf32>
    %c0_1 = arith.constant 0 : index
    %c0_2 = arith.constant 0 : index
    %4 = vector.load %arg0[%c0_1, %c0_2] : memref<7x1xi32, #tpu.memory_space<vmem>>, vector<7x1xi32>
    %5 = tpu.iota {dimensions = array<i32: 1>} : vector<7x5xi32>
    %6 = vector.broadcast %4 : vector<7x1xi32> to vector<7x5xi32>
    %7 = arith.cmpi eq, %6, %5 : vector<7x5xi32>
    %8 = arith.extui %7 : vector<7x5xi1> to vector<7x5xi32>
    %9 = arith.sitofp %8 : vector<7x5xi32> to vector<7x5xf32>
    %cst = arith.constant dense<0.000000e+00> : vector<7x40xf32>
    %10 = tpu.matmul %9, %1, %cst {dimension_numbers = #tpu.dot_dimension_numbers<[1], [0], [0], [1], [0, 0, 1, 1], [], []>} : vector<7x5xf32>, vector<5x40xf32>, vector<7x40xf32> -> vector<7x40xf32>
    %11 = tpu.iota {dimensions = array<i32: 0>} : vector<7x1xi32>
    %c0_i32 = arith.constant 0 : i32
    %12 = vector.broadcast %c0_i32 : i32 to vector<7x1xi32>
    %13 = arith.cmpi sgt, %11, %12 : vector<7x1xi32>
    %14 = arith.extui %13 : vector<7x1xi1> to vector<7x1xi32>
    %15 = arith.sitofp %14 : vector<7x1xi32> to vector<7x1xf32>
    %16 = vector.broadcast %15 : vector<7x1xf32> to vector<7x40xf32>
    %17 = vector.broadcast %3 : vector<1x40xf32> to vector<7x40xf32>
    %18 = arith.mulf %16, %17 : vector<7x40xf32>
    %19 = arith.addf %10, %18 : vector<7x40xf32>
    %cst_3 = arith.constant 0.000000e+00 : f32
    %20 = vector.broadcast %cst_3 : f32 to vector<1x10xf32>
    %cst_4 = arith.constant 0.000000e+00 : f32
    %21 = vector.broadcast %cst_4 : f32 to vector<1x10xf32>
    %cst_5 = arith.constant dense<0.000000e+00> : vector<1x40xf32>
    %22 = tpu.matmul %20, %2, %cst_5 {dimension_numbers = #tpu.dot_dimension_numbers<[1], [0], [0], [1], [0, 0, 1, 1], [], []>} : vector<1x10xf32>, vector<10x40xf32>, vector<1x40xf32> -> vector<1x40xf32>
    %23 = vector.extract_strided_slice %19 {offsets = [0, 0], sizes = [1, 40], strides = [1, 1]} : vector<7x40xf32> to vector<1x40xf32>
    %24 = arith.addf %22, %23 : vector<1x40xf32>
    %25 = arith.negf %24 : vector<1x40xf32>
    %26 = math.exp %25 : vector<1x40xf32>
    %cst_6 = arith.constant 1.000000e+00 : f32
    %27 = vector.broadcast %cst_6 : f32 to vector<1x40xf32>
    %28 = arith.addf %27, %26 : vector<1x40xf32>
    %29 = arith.divf %27, %28 : vector<1x40xf32>
    %30 = math.tanh %24 : vector<1x40xf32>
    %31 = vector.extract_strided_slice %29 {offsets = [0, 0], sizes = [1, 10], strides = [1, 1]} : vector<1x40xf32> to vector<1x10xf32>
    %32 = vector.extract_strided_slice %29 {offsets = [0, 10], sizes = [1, 10], strides = [1, 1]} : vector<1x40xf32> to vector<1x10xf32>
    %33 = vector.extract_strided_slice %30 {offsets = [0, 20], sizes = [1, 10], strides = [1, 1]} : vector<1x40xf32> to vector<1x10xf32>
    %34 = vector.extract_strided_slice %29 {offsets = [0, 30], sizes = [1, 10], strides = [1, 1]} : vector<1x40xf32> to vector<1x10xf32>
    %35 = arith.mulf %32, %21 : vector<1x10xf32>
    %36 = arith.mulf %31, %33 : vector<1x10xf32>
    %37 = arith.addf %35, %36 : vector<1x10xf32>
    %38 = math.tanh %37 : vector<1x10xf32>
    %39 = arith.mulf %34, %38 : vector<1x10xf32>
    %cst_7 = arith.constant dense<0.000000e+00> : vector<1x40xf32>
    %40 = tpu.matmul %39, %2, %cst_7 {dimension_numbers = #tpu.dot_dimension_numbers<[1], [0], [0], [1], [0, 0, 1, 1], [], []>} : vector<1x10xf32>, vector<10x40xf32>, vector<1x40xf32> -> vector<1x40xf32>
    %41 = vector.extract_strided_slice %19 {offsets = [1, 0], sizes = [1, 40], strides = [1, 1]} : vector<7x40xf32> to vector<1x40xf32>
    %42 = arith.addf %40, %41 : vector<1x40xf32>
    %43 = arith.negf %42 : vector<1x40xf32>
    %44 = math.exp %43 : vector<1x40xf32>
    %cst_8 = arith.constant 1.000000e+00 : f32
    %45 = vector.broadcast %cst_8 : f32 to vector<1x40xf32>
    %46 = arith.addf %45, %44 : vector<1x40xf32>
    %47 = arith.divf %45, %46 : vector<1x40xf32>
    %48 = math.tanh %42 : vector<1x40xf32>
    %49 = vector.extract_strided_slice %47 {offsets = [0, 0], sizes = [1, 10], strides = [1, 1]} : vector<1x40xf32> to vector<1x10xf32>
    %50 = vector.extract_strided_slice %47 {offsets = [0, 10], sizes = [1, 10], strides = [1, 1]} : vector<1x40xf32> to vector<1x10xf32>
    %51 = vector.extract_strided_slice %48 {offsets = [0, 20], sizes = [1, 10], strides = [1, 1]} : vector<1x40xf32> to vector<1x10xf32>
    %52 = vector.extract_strided_slice %47 {offsets = [0, 30], sizes = [1, 10], strides = [1, 1]} : vector<1x40xf32> to vector<1x10xf32>
    %53 = arith.mulf %50, %37 : vector<1x10xf32>
    %54 = arith.mulf %49, %51 : vector<1x10xf32>
    %55 = arith.addf %53, %54 : vector<1x10xf32>
    %56 = math.tanh %55 : vector<1x10xf32>
    %57 = arith.mulf %52, %56 : vector<1x10xf32>
    %cst_9 = arith.constant dense<0.000000e+00> : vector<1x40xf32>
    %58 = tpu.matmul %57, %2, %cst_9 {dimension_numbers = #tpu.dot_dimension_numbers<[1], [0], [0], [1], [0, 0, 1, 1], [], []>} : vector<1x10xf32>, vector<10x40xf32>, vector<1x40xf32> -> vector<1x40xf32>
    %59 = vector.extract_strided_slice %19 {offsets = [2, 0], sizes = [1, 40], strides = [1, 1]} : vector<7x40xf32> to vector<1x40xf32>
    %60 = arith.addf %58, %59 : vector<1x40xf32>
    %61 = arith.negf %60 : vector<1x40xf32>
    %62 = math.exp %61 : vector<1x40xf32>
    %cst_10 = arith.constant 1.000000e+00 : f32
    %63 = vector.broadcast %cst_10 : f32 to vector<1x40xf32>
    %64 = arith.addf %63, %62 : vector<1x40xf32>
    %65 = arith.divf %63, %64 : vector<1x40xf32>
    %66 = math.tanh %60 : vector<1x40xf32>
    %67 = vector.extract_strided_slice %65 {offsets = [0, 0], sizes = [1, 10], strides = [1, 1]} : vector<1x40xf32> to vector<1x10xf32>
    %68 = vector.extract_strided_slice %65 {offsets = [0, 10], sizes = [1, 10], strides = [1, 1]} : vector<1x40xf32> to vector<1x10xf32>
    %69 = vector.extract_strided_slice %66 {offsets = [0, 20], sizes = [1, 10], strides = [1, 1]} : vector<1x40xf32> to vector<1x10xf32>
    %70 = vector.extract_strided_slice %65 {offsets = [0, 30], sizes = [1, 10], strides = [1, 1]} : vector<1x40xf32> to vector<1x10xf32>
    %71 = arith.mulf %68, %55 : vector<1x10xf32>
    %72 = arith.mulf %67, %69 : vector<1x10xf32>
    %73 = arith.addf %71, %72 : vector<1x10xf32>
    %74 = math.tanh %73 : vector<1x10xf32>
    %75 = arith.mulf %70, %74 : vector<1x10xf32>
    %cst_11 = arith.constant dense<0.000000e+00> : vector<1x40xf32>
    %76 = tpu.matmul %75, %2, %cst_11 {dimension_numbers = #tpu.dot_dimension_numbers<[1], [0], [0], [1], [0, 0, 1, 1], [], []>} : vector<1x10xf32>, vector<10x40xf32>, vector<1x40xf32> -> vector<1x40xf32>
    %77 = vector.extract_strided_slice %19 {offsets = [3, 0], sizes = [1, 40], strides = [1, 1]} : vector<7x40xf32> to vector<1x40xf32>
    %78 = arith.addf %76, %77 : vector<1x40xf32>
    %79 = arith.negf %78 : vector<1x40xf32>
    %80 = math.exp %79 : vector<1x40xf32>
    %cst_12 = arith.constant 1.000000e+00 : f32
    %81 = vector.broadcast %cst_12 : f32 to vector<1x40xf32>
    %82 = arith.addf %81, %80 : vector<1x40xf32>
    %83 = arith.divf %81, %82 : vector<1x40xf32>
    %84 = math.tanh %78 : vector<1x40xf32>
    %85 = vector.extract_strided_slice %83 {offsets = [0, 0], sizes = [1, 10], strides = [1, 1]} : vector<1x40xf32> to vector<1x10xf32>
    %86 = vector.extract_strided_slice %83 {offsets = [0, 10], sizes = [1, 10], strides = [1, 1]} : vector<1x40xf32> to vector<1x10xf32>
    %87 = vector.extract_strided_slice %84 {offsets = [0, 20], sizes = [1, 10], strides = [1, 1]} : vector<1x40xf32> to vector<1x10xf32>
    %88 = vector.extract_strided_slice %83 {offsets = [0, 30], sizes = [1, 10], strides = [1, 1]} : vector<1x40xf32> to vector<1x10xf32>
    %89 = arith.mulf %86, %73 : vector<1x10xf32>
    %90 = arith.mulf %85, %87 : vector<1x10xf32>
    %91 = arith.addf %89, %90 : vector<1x10xf32>
    %92 = math.tanh %91 : vector<1x10xf32>
    %93 = arith.mulf %88, %92 : vector<1x10xf32>
    %cst_13 = arith.constant dense<0.000000e+00> : vector<1x40xf32>
    %94 = tpu.matmul %93, %2, %cst_13 {dimension_numbers = #tpu.dot_dimension_numbers<[1], [0], [0], [1], [0, 0, 1, 1], [], []>} : vector<1x10xf32>, vector<10x40xf32>, vector<1x40xf32> -> vector<1x40xf32>
    %95 = vector.extract_strided_slice %19 {offsets = [4, 0], sizes = [1, 40], strides = [1, 1]} : vector<7x40xf32> to vector<1x40xf32>
    %96 = arith.addf %94, %95 : vector<1x40xf32>
    %97 = arith.negf %96 : vector<1x40xf32>
    %98 = math.exp %97 : vector<1x40xf32>
    %cst_14 = arith.constant 1.000000e+00 : f32
    %99 = vector.broadcast %cst_14 : f32 to vector<1x40xf32>
    %100 = arith.addf %99, %98 : vector<1x40xf32>
    %101 = arith.divf %99, %100 : vector<1x40xf32>
    %102 = math.tanh %96 : vector<1x40xf32>
    %103 = vector.extract_strided_slice %101 {offsets = [0, 0], sizes = [1, 10], strides = [1, 1]} : vector<1x40xf32> to vector<1x10xf32>
    %104 = vector.extract_strided_slice %101 {offsets = [0, 10], sizes = [1, 10], strides = [1, 1]} : vector<1x40xf32> to vector<1x10xf32>
    %105 = vector.extract_strided_slice %102 {offsets = [0, 20], sizes = [1, 10], strides = [1, 1]} : vector<1x40xf32> to vector<1x10xf32>
    %106 = vector.extract_strided_slice %101 {offsets = [0, 30], sizes = [1, 10], strides = [1, 1]} : vector<1x40xf32> to vector<1x10xf32>
    %107 = arith.mulf %104, %91 : vector<1x10xf32>
    %108 = arith.mulf %103, %105 : vector<1x10xf32>
    %109 = arith.addf %107, %108 : vector<1x10xf32>
    %110 = math.tanh %109 : vector<1x10xf32>
    %111 = arith.mulf %106, %110 : vector<1x10xf32>
    %cst_15 = arith.constant dense<0.000000e+00> : vector<1x40xf32>
    %112 = tpu.matmul %111, %2, %cst_15 {dimension_numbers = #tpu.dot_dimension_numbers<[1], [0], [0], [1], [0, 0, 1, 1], [], []>} : vector<1x10xf32>, vector<10x40xf32>, vector<1x40xf32> -> vector<1x40xf32>
    %113 = vector.extract_strided_slice %19 {offsets = [5, 0], sizes = [1, 40], strides = [1, 1]} : vector<7x40xf32> to vector<1x40xf32>
    %114 = arith.addf %112, %113 : vector<1x40xf32>
    %115 = arith.negf %114 : vector<1x40xf32>
    %116 = math.exp %115 : vector<1x40xf32>
    %cst_16 = arith.constant 1.000000e+00 : f32
    %117 = vector.broadcast %cst_16 : f32 to vector<1x40xf32>
    %118 = arith.addf %117, %116 : vector<1x40xf32>
    %119 = arith.divf %117, %118 : vector<1x40xf32>
    %120 = math.tanh %114 : vector<1x40xf32>
    %121 = vector.extract_strided_slice %119 {offsets = [0, 0], sizes = [1, 10], strides = [1, 1]} : vector<1x40xf32> to vector<1x10xf32>
    %122 = vector.extract_strided_slice %119 {offsets = [0, 10], sizes = [1, 10], strides = [1, 1]} : vector<1x40xf32> to vector<1x10xf32>
    %123 = vector.extract_strided_slice %120 {offsets = [0, 20], sizes = [1, 10], strides = [1, 1]} : vector<1x40xf32> to vector<1x10xf32>
    %124 = vector.extract_strided_slice %119 {offsets = [0, 30], sizes = [1, 10], strides = [1, 1]} : vector<1x40xf32> to vector<1x10xf32>
    %125 = arith.mulf %122, %109 : vector<1x10xf32>
    %126 = arith.mulf %121, %123 : vector<1x10xf32>
    %127 = arith.addf %125, %126 : vector<1x10xf32>
    %128 = math.tanh %127 : vector<1x10xf32>
    %129 = arith.mulf %124, %128 : vector<1x10xf32>
    %cst_17 = arith.constant dense<0.000000e+00> : vector<1x40xf32>
    %130 = tpu.matmul %129, %2, %cst_17 {dimension_numbers = #tpu.dot_dimension_numbers<[1], [0], [0], [1], [0, 0, 1, 1], [], []>} : vector<1x10xf32>, vector<10x40xf32>, vector<1x40xf32> -> vector<1x40xf32>
    %131 = vector.extract_strided_slice %19 {offsets = [6, 0], sizes = [1, 40], strides = [1, 1]} : vector<7x40xf32> to vector<1x40xf32>
    %132 = arith.addf %130, %131 : vector<1x40xf32>
    %133 = arith.negf %132 : vector<1x40xf32>
    %134 = math.exp %133 : vector<1x40xf32>
    %cst_18 = arith.constant 1.000000e+00 : f32
    %135 = vector.broadcast %cst_18 : f32 to vector<1x40xf32>
    %136 = arith.addf %135, %134 : vector<1x40xf32>
    %137 = arith.divf %135, %136 : vector<1x40xf32>
    %138 = math.tanh %132 : vector<1x40xf32>
    %139 = vector.extract_strided_slice %137 {offsets = [0, 0], sizes = [1, 10], strides = [1, 1]} : vector<1x40xf32> to vector<1x10xf32>
    %140 = vector.extract_strided_slice %137 {offsets = [0, 10], sizes = [1, 10], strides = [1, 1]} : vector<1x40xf32> to vector<1x10xf32>
    %141 = vector.extract_strided_slice %138 {offsets = [0, 20], sizes = [1, 10], strides = [1, 1]} : vector<1x40xf32> to vector<1x10xf32>
    %142 = vector.extract_strided_slice %137 {offsets = [0, 30], sizes = [1, 10], strides = [1, 1]} : vector<1x40xf32> to vector<1x10xf32>
    %143 = arith.mulf %140, %127 : vector<1x10xf32>
    %144 = arith.mulf %139, %141 : vector<1x10xf32>
    %145 = arith.addf %143, %144 : vector<1x10xf32>
    %146 = math.tanh %145 : vector<1x10xf32>
    %147 = arith.mulf %142, %146 : vector<1x10xf32>
    %148 = tpu.concatenate %57, %75, %93, %111, %129, %147 in 0 : vector<1x10xf32>, vector<1x10xf32>, vector<1x10xf32>, vector<1x10xf32>, vector<1x10xf32>, vector<1x10xf32> -> vector<6x10xf32>
    %149 = vector.extract_strided_slice %148 {offsets = [0, 0], sizes = [6, 5], strides = [1, 1]} : vector<6x10xf32> to vector<6x5xf32>
    %c0_19 = arith.constant 0 : index
    %c0_20 = arith.constant 0 : index
    %150 = vector.load %arg2[%c0_19, %c0_20] : memref<6x5xf32, #tpu.memory_space<vmem>>, vector<6x5xf32>
    tpu.vector_store %arg2[%c0_19, %c0_20], %149 {strides = array<i32>} : memref<6x5xf32, #tpu.memory_space<vmem>>, vector<6x5xf32>,
    return
  }
}

</mosaic_0001>

<bundles_post_ra>
// kernel: tpu_custom_call.1
= control target key start
LH: loop header
LB: loop body
LE: loop exit
PB: predicated region body
PF: predicated region fallthrough
CT: control target
= control target key end

     0   :  { %7 = vsyncpa [#allocation3], 0  ;;  %s1287_s0 = inlined_call_operand.vmem [shape: s32[7,1], index: 0, kind: input, shape index: {}]   ;;  %s1288_s1 = inlined_call_operand.hbm [shape: f32[16,40], index: 1, kind: input, shape index: {}]   ;;  %s1289_s2 = inlined_call_operand.hbm [shape: f32[6,5], index: 2, kind: output, shape index: {}]  }
   0x1   :  { %8 = vsyncpa [#allocation4], 0  ;;  %s1125_s9 = smov [#allocation2]   ;;  %s1077_s13 = scalar_lea.hbm %s1288_s1, 256 }
   0x2   :  { %s16_s10 = sshll.u32 %s1125_s9, 4  ;;  %p1078_p0 = scmp.ne.s32.totalorder %s1288_s1, %s1077_s13  ;;  %s17_s10 = int_to_ptr.vmem [resolvable:$true] %s16_s10 }
   0x3   :  { %p1081_p1 = scmp.lt.u32.totalorder %s1077_s13, %s1288_s1 }
   0x5   :  { %p1083_p2 = pnand %p1081_p1, %p1078_p0 }
   0x7   :  { %1086 = shalt.err (!%p1083_p2)
}
   0x8   :  { %s1087_s18 = scalar_lea.vmem %s17_s10, 256  ;;  %p1092_p4 = scmp.lt.s32.totalorder %s17_s10, %s17_s10 }
   0x9   :  { %p1088_p3 = scmp.ne.s32.totalorder %s17_s10, %s1087_s18  ;;  %p1093_p5 = scmp.lt.s32.totalorder %s1087_s18, %s1087_s18 }
   0xb   :  { %p1094_p6 = por %p1093_p5, %p1092_p4 }
   0xd   :  { %p1095_p7 = pnand %p1094_p6, %p1088_p3 }
   0xf   :  { %1098 = shalt.err (!%p1095_p7)
}
  0x10   :  { %s1126_s19 = smov 128   ;;  %s1127_s20 = smov 8  }
  0x11   :  { %22 = dma.hbm_to_vmem [thread:$0]  %s1288_s1, 256, %s17_s10, [#allocation3], %s1126_s19, %s1126_s19, %s1127_s20  }
  0x12   :  { %1121 = dma.done.wait [#allocation3], 256  }
  0x13   :  { %1122 = vsyncadd [#allocation3], 4294967040  ;;  %v1128_v0 = vmov 0   ;;  %v1129_v1 = vmov 0.0|0.0   ;;  %v1130_v2 = vmov 0.0   ;;  %vm126_vm0 = vcmask 1042432  }
  0x14   :  { %1020 = vset.pattern.permute.xlu0 %v1128_v0  ;;  %979 = vmatprep.subr.bf16.mxu1 %v1129_v1  ;;  %v28_v3 = vld [vmem:[%s1287_s0] sm:$0x7f]  ;;  %v29_v4 = vlaneseq  ;;  %v27_v6 = vld [vmem:[#allocation2 + $0x8] sm:$0xff]  ;;  %vm135_vm1 = vcmask 1041408   ;;  %vm51_vm2 = vcmask 1044480   ;;  %vm1131_vm3 = vmmov 0  }
  0x15   :  { %925 = vmatprep.subr.mxu0 %v1130_v2  ;;  %v26_v5 = vld [vmem:[#allocation2] sm:$0xff]  ;;  %32 = vperm.xlu0 %1020, %v28_v3   ;;  %v128_v8 = vrot.slane %v27_v6, 5  ;;  %vm1132_vm4 = vmmov 1   ;;  %vm47_vm7 = vcmask 39936   ;;  %s1133_s0 = smov 108   ;;  %s1134_s1 = smov 10  }
  0x16   :  { %v127_v7 = vrot.slane %v26_v5, 5  ;;  %926 = vmatpush3.msk.msra.mxu0 %vm51_vm2, %v26_v5  ;;  %927 = vmatprep.mubr.msk.f32.mxu0 %vm1131_vm3, %v1130_v2  ;;  %vm1175_vm5 = vmpackc.low %vm135_vm1, %vm1132_vm4  ;;  %v38_v11 = vshrl.u32 %v29_v4, 7  ;;  %v30_v17 = vand.u32 127, %v29_v4  ;;  %s1135_s25 = smov 20   ;;  %s1136_s26 = smov 98   ;;  %vm131_vm9 = vcmask 80896  }
  0x17   :  { %934 = vmatprep.mubr.msk.f32.mxu1 %vm1131_vm3, %v1130_v2  ;;  %983 = vmatprep.subr.bf16.mxu0 %v1129_v1  ;;  %vm850_vm10 = vcmask 1040384   ;;  %vm854_vm11 = vcmask 1043456   ;;  %s1137_s27 = smov [#allocation5]   ;;  %vm861_vm12 = vcmask 37888  }
  0x18   :  { %v129_v9 = vsel %vm126_vm0, %v127_v7, %v128_v8  ;;  %vm39_vm6 = vcmp.gt.s32.totalorder %v38_v11, 0  ;;  %v44_v13 = vsub.s32 7, %v38_v11  ;;  %s869_s28 = sshll.u32 %s1137_s27, 4  ;;  %s870_s28 = int_to_ptr.vmem [resolvable:$true] %s869_s28 }
  0x19   :  { %v1182_v12 = vpack.c.bf16 %v128_v8, %v129_v9  ;;  %v879_v14 = vsel %vm39_vm6, 1.0, %v1130_v2  ;;  %s1099_s29 = scalar_lea.vmem %s870_s28, 128  ;;  %p1104_p9 = scmp.lt.s32.totalorder %s870_s28, %s870_s28 }
  0x1a   :  { %v45_v15 = vrot.slane %v27_v6, %v44_v13  ;;  %p1100_p8 = scmp.ne.s32.totalorder %s870_s28, %s1099_s29  ;;  %p1105_p10 = scmp.lt.s32.totalorder %s1099_s29, %s1099_s29 }
  0x1b   :  { %982 = vmatpush3.bf16.msk.msra.mxu1 %vm1175_vm5, %v1182_v12 }
  0x1c   :  { %987 = vmatprep.subr.bf16.mxu1 %v1129_v1  ;;  %v46_v16 = vmul.f32 %v879_v14, %v45_v15  ;;  %p1106_p11 = por %p1105_p10, %p1104_p9 }
  0x1e   :  { %935 = vmatmul.mubr.f32.vlgmr.msra.gmra.mrb[0].mxu1 %v1130_v2  ;;  %p1107_p12 = pnand %p1106_p11, %p1100_p8 }
  0x1f   :  { %990 = vmatpush3.bf16.msk.msra.mxu1 %vm1175_vm5, %v1182_v12  ;;  %948 = vmatprep.mubr.msk.f32.mxu1 %vm1131_vm3, %v1130_v2 }
  0x20   :  { %995 = vmatprep.subr.bf16.mxu1 %v1129_v1 }
  0x94   :  { %v33_v18 = vpop.permute.xlu0 %32 }
  0x95   :  { %vm34_vm8 = vcmp.eq.s32.totalorder %v33_v18, %v30_v17 }
  0x96   :  { %v878_v19 = vsel %vm34_vm8, 1.0, %v1130_v2 }
  0x97   :  { %928 = vmatmul.mubr.msk.f32.vlgmr.msra.gmra.mrb[0].mxu0 %vm47_vm7, %v878_v19 }
  0x98   :  { %986 = vmatpush3.bf16.msk.msra.mxu0 %vm1175_vm5, %v1182_v12  ;;  %941 = vmatprep.mubr.msk.f32.mxu0 %vm1131_vm3, %v1130_v2 }
  0x99   :  { %991 = vmatprep.subr.bf16.mxu0 %v1129_v1 }
  0xf1   :  { %v204_v20 = vpop.f32.mrb[0].mxu1 }
  0xf2   :  { %v936_v21 = vpop.f32.mrb[1].mxu1 }
 0x16a   :  { %v121_v22 = vpop.f32.mrb[0].mxu0 }
 0x16b   :  { %v1203_v23 = vadd.f32 %v121_v22, %v46_v16  ;;  %v929_v24 = vpop.f32.mrb[1].mxu0 }
 0x16d   :  { %v205_v25 = vadd.f32 %v204_v20, %v1203_v23  ;;  %v236_v40 = vrot.slane %v1203_v23, 1  ;;  %v337_v58 = vrot.slane %v1203_v23, 2  ;;  %v438_v15 = vrot.slane %v1203_v23, 3 }
 0x16f   :  { %1021 = vtanh.f32 %v205_v25  ;;  %v883_v27 = vmul.f32 -1.442695, %v205_v25 }
 0x171   :  { %1023 = vpow2.f32 %v883_v27 }
 0x179   :  { %v1022_v26 = vpop.eup %1021 }
 0x17a   :  { %217 = vrot.lane.b32.xlu0 %v1022_v26, %s1133_s0 }
 0x17b   :  { %v1024_v28 = vpop.eup %1023 }
 0x17c   :  { %v211_v29 = vadd.f32 1.0, %v1024_v28 }
 0x17e   :  { %1025 = vrcp.f32 %v211_v29 }
 0x188   :  { %v1026_v30 = vpop.eup %1025 }
 0x189   :  { %v215_v33 = vmul.f32 0.0, %v1026_v30 }
 0x1ec   :  { %v218_v31 = vpop.permute.xlu0 %217 }
 0x1ed   :  { %v220_v32 = vmul.f32 %v1026_v30, %v218_v31 }
 0x1ef   :  { %222 = vrot.lane.b32.xlu1 %v220_v32, %s1134_s1 }
 0x261   :  { %v223_v34 = vpop.permute.xlu1 %222 }
 0x262   :  { %v225_v35 = vadd.f32 %v223_v34, %v215_v33 }
 0x264   :  { %1027 = vtanh.f32 %v225_v35 }
 0x26e   :  { %v1028_v36 = vpop.eup %1027 }
 0x26f   :  { %228 = vrot.lane.b32.xlu1 %v1028_v36, %s1135_s25 }
 0x2e1   :  { %v229_v37 = vpop.permute.xlu1 %228 }
 0x2e2   :  { %v231_v38 = vmul.f32 %v1026_v30, %v229_v37 }
 0x2e4   :  { %233 = vrot.lane.b32.xlu0 %v231_v38, %s1136_s26  ;;  %v539_v38 = vrot.slane %v1203_v23, 4 }
 0x356   :  { %v234_v39 = vpop.permute.xlu0 %233 }
 0x357   :  { %942 = vmatmul.mubr.msk.f32.vlgmr.msra.gmra.mrb[2].mxu0 %vm131_vm9, %v234_v39 }
 0x358   :  { %994 = vmatpush3.bf16.msk.msra.mxu0 %vm1175_vm5, %v1182_v12  ;;  %955 = vmatprep.mubr.msk.f32.mxu0 %vm1131_vm3, %v1130_v2 }
 0x359   :  { %999 = vmatprep.subr.bf16.mxu0 %v1129_v1 }
 0x42a   :  { %v306_v41 = vpop.f32.mrb[2].mxu0 }
 0x42b   :  { %v307_v42 = vadd.f32 %v306_v41, %v236_v40  ;;  %v943_v43 = vpop.f32.mrb[3].mxu0 }
 0x42d   :  { %1029 = vtanh.f32 %v307_v42  ;;  %v886_v45 = vmul.f32 -1.442695, %v307_v42 }
 0x42f   :  { %1031 = vpow2.f32 %v886_v45 }
 0x437   :  { %v1030_v44 = vpop.eup %1029 }
 0x438   :  { %319 = vrot.lane.b32.xlu1 %v1030_v44, %s1133_s0 }
 0x439   :  { %v1032_v46 = vpop.eup %1031 }
 0x43a   :  { %v313_v47 = vadd.f32 1.0, %v1032_v46 }
 0x43c   :  { %1033 = vrcp.f32 %v313_v47 }
 0x446   :  { %v1034_v48 = vpop.eup %1033 }
 0x447   :  { %v317_v51 = vmul.f32 %v1034_v48, %v225_v35 }
 0x4aa   :  { %v320_v49 = vpop.permute.xlu1 %319 }
 0x4ab   :  { %v322_v50 = vmul.f32 %v1034_v48, %v320_v49 }
 0x4ad   :  { %324 = vrot.lane.b32.xlu0 %v322_v50, %s1134_s1 }
 0x51f   :  { %v325_v52 = vpop.permute.xlu0 %324 }
 0x520   :  { %v327_v53 = vadd.f32 %v325_v52, %v317_v51 }
 0x522   :  { %1035 = vtanh.f32 %v327_v53 }
 0x52c   :  { %v1036_v54 = vpop.eup %1035 }
 0x52d   :  { %330 = vrot.lane.b32.xlu1 %v1036_v54, %s1135_s25 }
 0x59f   :  { %v331_v55 = vpop.permute.xlu1 %330 }
 0x5a0   :  { %v1221_v56 = vmul.f32 %v1034_v48, %v331_v55  ;;  %v640_v55 = vrot.slane %v1203_v23, 5 }
 0x5a2   :  { %335 = vrot.lane.b32.xlu0 %v1221_v56, %s1136_s26 }
 0x614   :  { %v336_v57 = vpop.permute.xlu0 %335 }
 0x615   :  { %949 = vmatmul.mubr.msk.f32.vlgmr.msra.gmra.mrb[2].mxu1 %vm131_vm9, %v336_v57 }
 0x616   :  { %998 = vmatpush3.bf16.msk.msra.mxu1 %vm1175_vm5, %v1182_v12  ;;  %962 = vmatprep.mubr.msk.f32.mxu1 %vm1131_vm3, %v1130_v2 }
 0x617   :  { %1003 = vmatprep.subr.bf16.mxu1 %v1129_v1 }
 0x6e8   :  { %v407_v59 = vpop.f32.mrb[2].mxu1 }
 0x6e9   :  { %v408_v60 = vadd.f32 %v407_v59, %v337_v58  ;;  %v950_v61 = vpop.f32.mrb[3].mxu1 }
 0x6eb   :  { %1037 = vtanh.f32 %v408_v60  ;;  %v889_v63 = vmul.f32 -1.442695, %v408_v60 }
 0x6ed   :  { %1039 = vpow2.f32 %v889_v63 }
 0x6f5   :  { %v1038_v62 = vpop.eup %1037 }
 0x6f6   :  { %420 = vrot.lane.b32.xlu1 %v1038_v62, %s1133_s0 }
 0x6f7   :  { %v1040_v0 = vpop.eup %1039 }
 0x6f8   :  { %v414_v3 = vadd.f32 1.0, %v1040_v0 }
 0x6fa   :  { %1041 = vrcp.f32 %v414_v3 }
 0x704   :  { %v1042_v4 = vpop.eup %1041 }
 0x705   :  { %v418_v1 = vmul.f32 %v1042_v4, %v327_v53 }
 0x768   :  { %v421_v5 = vpop.permute.xlu1 %420 }
 0x769   :  { %v423_v6 = vmul.f32 %v1042_v4, %v421_v5 }
 0x76b   :  { %425 = vrot.lane.b32.xlu0 %v423_v6, %s1134_s1 }
 0x7dd   :  { %v426_v7 = vpop.permute.xlu0 %425 }
 0x7de   :  { %v428_v8 = vadd.f32 %v426_v7, %v418_v1 }
 0x7e0   :  { %1043 = vtanh.f32 %v428_v8 }
 0x7ea   :  { %v1044_v9 = vpop.eup %1043 }
 0x7eb   :  { %431 = vrot.lane.b32.xlu1 %v1044_v9, %s1135_s25 }
 0x85d   :  { %v432_v11 = vpop.permute.xlu1 %431 }
 0x85e   :  { %v434_v13 = vmul.f32 %v1042_v4, %v432_v11 }
 0x860   :  { %436 = vrot.lane.b32.xlu0 %v434_v13, %s1136_s26  ;;  %v839_v31 = vrot.slane %v434_v13, 7 }
 0x862   :  { %v851_v35 = vsel %vm850_vm10, %v1221_v56, %v839_v31 }
 0x8d2   :  { %v437_v14 = vpop.permute.xlu0 %436 }
 0x8d3   :  { %956 = vmatmul.mubr.msk.f32.vlgmr.msra.gmra.mrb[4].mxu0 %vm131_vm9, %v437_v14  ;;  %v741_v14 = vrot.slane %v1203_v23, 6 }
 0x8d4   :  { %1002 = vmatpush3.bf16.msk.msra.mxu0 %vm1175_vm5, %v1182_v12  ;;  %969 = vmatprep.mubr.msk.f32.mxu0 %vm1131_vm3, %v1130_v2 }
 0x9a6   :  { %v508_v16 = vpop.f32.mrb[4].mxu0 }
 0x9a7   :  { %v509_v17 = vadd.f32 %v508_v16, %v438_v15  ;;  %v957_v18 = vpop.f32.mrb[5].mxu0 }
 0x9a9   :  { %1045 = vtanh.f32 %v509_v17  ;;  %v892_v20 = vmul.f32 -1.442695, %v509_v17 }
 0x9ab   :  { %1047 = vpow2.f32 %v892_v20 }
 0x9b3   :  { %v1046_v19 = vpop.eup %1045 }
 0x9b4   :  { %521 = vrot.lane.b32.xlu1 %v1046_v19, %s1133_s0 }
 0x9b5   :  { %v1048_v21 = vpop.eup %1047 }
 0x9b6   :  { %v515_v22 = vadd.f32 1.0, %v1048_v21 }
 0x9b8   :  { %1049 = vrcp.f32 %v515_v22 }
 0x9c2   :  { %v1050_v24 = vpop.eup %1049 }
 0x9c3   :  { %v519_v27 = vmul.f32 %v1050_v24, %v428_v8 }
 0xa26   :  { %v522_v25 = vpop.permute.xlu1 %521 }
 0xa27   :  { %v524_v26 = vmul.f32 %v1050_v24, %v522_v25 }
 0xa29   :  { %526 = vrot.lane.b32.xlu0 %v524_v26, %s1134_s1 }
 0xa9b   :  { %v527_v28 = vpop.permute.xlu0 %526 }
 0xa9c   :  { %v529_v29 = vadd.f32 %v527_v28, %v519_v27 }
 0xa9e   :  { %1051 = vtanh.f32 %v529_v29 }
 0xaa8   :  { %v1052_v30 = vpop.eup %1051 }
 0xaa9   :  { %532 = vrot.lane.b32.xlu1 %v1052_v30, %s1135_s25 }
 0xb1b   :  { %v533_v32 = vpop.permute.xlu1 %532 }
 0xb1c   :  { %v535_v33 = vmul.f32 %v1050_v24, %v533_v32 }
 0xb1e   :  { %v841_v34 = vrot.slane %v535_v33, 6  ;;  %537 = vrot.lane.b32.xlu0 %v535_v33, %s1136_s26 }
 0xb20   :  { %v852_v36 = vsel %vm135_vm1, %v851_v35, %v841_v34 }
 0xb90   :  { %v538_v37 = vpop.permute.xlu0 %537 }
 0xb91   :  { %963 = vmatmul.mubr.msk.f32.vlgmr.msra.gmra.mrb[4].mxu1 %vm131_vm9, %v538_v37 }
 0xb92   :  { %1006 = vmatpush3.bf16.msk.msra.mxu1 %vm1175_vm5, %v1182_v12  ;;  %976 = vmatprep.mubr.msk.f32.mxu1 %vm1131_vm3, %v1130_v2 }
 0xc64   :  { %v609_v39 = vpop.f32.mrb[4].mxu1 }
 0xc65   :  { %v610_v40 = vadd.f32 %v609_v39, %v539_v38  ;;  %v964_v41 = vpop.f32.mrb[5].mxu1 }
 0xc67   :  { %1053 = vtanh.f32 %v610_v40  ;;  %v895_v43 = vmul.f32 -1.442695, %v610_v40 }
 0xc69   :  { %1055 = vpow2.f32 %v895_v43 }
 0xc71   :  { %v1054_v42 = vpop.eup %1053 }
 0xc72   :  { %622 = vrot.lane.b32.xlu1 %v1054_v42, %s1133_s0 }
 0xc73   :  { %v1056_v44 = vpop.eup %1055 }
 0xc74   :  { %v616_v45 = vadd.f32 1.0, %v1056_v44 }
 0xc76   :  { %1057 = vrcp.f32 %v616_v45 }
 0xc80   :  { %v1058_v46 = vpop.eup %1057 }
 0xc81   :  { %v620_v2 = vmul.f32 %v1058_v46, %v529_v29 }
 0xce4   :  { %v623_v10 = vpop.permute.xlu1 %622 }
 0xce5   :  { %v625_v12 = vmul.f32 %v1058_v46, %v623_v10 }
 0xce7   :  { %627 = vrot.lane.b32.xlu0 %v625_v12, %s1134_s1 }
 0xd59   :  { %v628_v47 = vpop.permute.xlu0 %627 }
 0xd5a   :  { %v630_v48 = vadd.f32 %v628_v47, %v620_v2 }
 0xd5c   :  { %1059 = vtanh.f32 %v630_v48 }
 0xd66   :  { %v1060_v49 = vpop.eup %1059 }
 0xd67   :  { %633 = vrot.lane.b32.xlu1 %v1060_v49, %s1135_s25 }
 0xdd9   :  { %v634_v50 = vpop.permute.xlu1 %633 }
 0xdda   :  { %v636_v51 = vmul.f32 %v1058_v46, %v634_v50 }
 0xddc   :  { %v843_v52 = vrot.slane %v636_v51, 5  ;;  %638 = vrot.lane.b32.xlu0 %v636_v51, %s1136_s26 }
 0xdde   :  { %v853_v53 = vsel %vm126_vm0, %v852_v36, %v843_v52 }
 0xe4e   :  { %v639_v54 = vpop.permute.xlu0 %638 }
 0xe4f   :  { %970 = vmatmul.mubr.msk.f32.vlgmr.msra.gmra.mrb[6].mxu0 %vm131_vm9, %v639_v54 }
 0xf22   :  { %v710_v56 = vpop.f32.mrb[6].mxu0 }
 0xf23   :  { %v711_v57 = vadd.f32 %v710_v56, %v640_v55  ;;  %v971_v58 = vpop.f32.mrb[7].mxu0 }
 0xf25   :  { %1061 = vtanh.f32 %v711_v57  ;;  %v898_v60 = vmul.f32 -1.442695, %v711_v57 }
 0xf27   :  { %1063 = vpow2.f32 %v898_v60 }
 0xf2f   :  { %v1062_v59 = vpop.eup %1061 }
 0xf30   :  { %723 = vrot.lane.b32.xlu1 %v1062_v59, %s1133_s0 }
 0xf31   :  { %v1064_v61 = vpop.eup %1063 }
 0xf32   :  { %v717_v62 = vadd.f32 1.0, %v1064_v61 }
 0xf34   :  { %1065 = vrcp.f32 %v717_v62 }
 0xf3e   :  { %v1066_v63 = vpop.eup %1065 }
 0xf3f   :  { %v721_v4 = vmul.f32 %v1066_v63, %v630_v48 }
 0xfa2   :  { %v724_v0 = vpop.permute.xlu1 %723 }
 0xfa3   :  { %v726_v3 = vmul.f32 %v1066_v63, %v724_v0 }
 0xfa5   :  { %728 = vrot.lane.b32.xlu0 %v726_v3, %s1134_s1 }
0x1017   :  { %v729_v5 = vpop.permute.xlu0 %728 }
0x1018   :  { %v731_v6 = vadd.f32 %v729_v5, %v721_v4 }
0x101a   :  { %1067 = vtanh.f32 %v731_v6 }
0x1024   :  { %v1068_v1 = vpop.eup %1067 }
0x1025   :  { %734 = vrot.lane.b32.xlu1 %v1068_v1, %s1135_s25 }
0x1097   :  { %v735_v7 = vpop.permute.xlu1 %734 }
0x1098   :  { %v737_v8 = vmul.f32 %v1066_v63, %v735_v7 }
0x109a   :  { %v845_v9 = vrot.slane %v737_v8, 4  ;;  %739 = vrot.lane.b32.xlu0 %v737_v8, %s1136_s26 }
0x109c   :  { %v855_v11 = vsel %vm854_vm11, %v853_v53, %v845_v9 }
0x110c   :  { %v740_v13 = vpop.permute.xlu0 %739 }
0x110d   :  { %977 = vmatmul.mubr.msk.f32.vlgmr.msra.gmra.mrb[6].mxu1 %vm131_vm9, %v740_v13 }
0x11e0   :  { %v811_v15 = vpop.f32.mrb[6].mxu1 }
0x11e1   :  { %v812_v16 = vadd.f32 %v811_v15, %v741_v14  ;;  %v978_v17 = vpop.f32.mrb[7].mxu1 }
0x11e3   :  { %1069 = vtanh.f32 %v812_v16  ;;  %v901_v19 = vmul.f32 -1.442695, %v812_v16 }
0x11e5   :  { %1071 = vpow2.f32 %v901_v19 }
0x11ed   :  { %v1070_v18 = vpop.eup %1069 }
0x11ee   :  { %824 = vrot.lane.b32.xlu1 %v1070_v18, %s1133_s0 }
0x11ef   :  { %v1072_v20 = vpop.eup %1071 }
0x11f0   :  { %v818_v21 = vadd.f32 1.0, %v1072_v20 }
0x11f2   :  { %1073 = vrcp.f32 %v818_v21 }
0x11fc   :  { %v1074_v22 = vpop.eup %1073 }
0x11fd   :  { %v822_v26 = vmul.f32 %v1074_v22, %v731_v6 }
0x1260   :  { %v825_v24 = vpop.permute.xlu1 %824 }
0x1261   :  { %v827_v25 = vmul.f32 %v1074_v22, %v825_v24 }
0x1263   :  { %829 = vrot.lane.b32.xlu0 %v827_v25, %s1134_s1 }
0x12d5   :  { %v830_v27 = vpop.permute.xlu0 %829 }
0x12d6   :  { %v832_v23 = vadd.f32 %v830_v27, %v822_v26 }
0x12d8   :  { %1075 = vtanh.f32 %v832_v23 }
0x12e2   :  { %v1076_v28 = vpop.eup %1075 }
0x12e3   :  { %835 = vrot.lane.b32.xlu1 %v1076_v28, %s1135_s25 }
0x1355   :  { %v836_v29 = vpop.permute.xlu1 %835 }
0x1356   :  { %v838_v30 = vmul.f32 %v1074_v22, %v836_v29 }
0x1358   :  { %v848_v31 = vrot.slane %v838_v30, 3 }
0x135a   :  { %v856_v32 = vsel %vm51_vm2, %v855_v11, %v848_v31 }
0x135b   :  { %858 = vrot.lane.b32.xlu0 %v856_v32, %s1136_s26 }
0x13cd   :  { %v859_v33 = vpop.permute.xlu0 %858 }
0x13ce   :  { %862 = vst.msk [vmem:[#allocation5] sm:$0x3f] %vm861_vm12, %v859_v33 }
0x13cf   :  { %1110 = shalt.err (!%p1107_p12)
}
0x13d0   :  { %s1111_s4 = scalar_lea.hbm %s1289_s2, 128 }
0x13d1   :  { %p1112_p13 = scmp.ne.s32.totalorder %s1289_s2, %s1111_s4  ;;  %p1115_p0 = scmp.lt.u32.totalorder %s1111_s4, %s1289_s2 }
0x13d3   :  { %p1117_p1 = pnand %p1115_p0, %p1112_p13 }
0x13d5   :  { %1120 = shalt.err (!%p1117_p1)
}
0x13d6   :  { %872 = dma.vmem_to_hbm [thread:$0]  %s870_s28, 128, %s1289_s2, [#allocation4]  }
0x13d7   :  { %1123 = dma.done.wait [#allocation4], 128  }
0x13d8   :  { %1124 = vsyncadd [#allocation4], 4294967168 }
0x13d9   :  { %876 = vsyncpa [#allocation3], 1 }
0x13da   :  { %877 = vsyncpa [#allocation4], 1 }

</bundles_post_ra>
